<compile_context>
chip_gen: v6e
topology: v6e:2x2x1
jax: 0.10.0
libtpu: 0.0.40
codegen_flags: <defaults>
</compile_context>

<pallas_src>
import functools

import jax
import jax.numpy as jnp
from jax.experimental import pallas as pl
from jax.experimental.pallas import tpu as pltpu
import numpy as np


# Standard JPEG chrominance quantization table (same constant as in
# jpeg_compression/jpeg_utils.py).
C_TABLE = np.full((8, 8), 99, dtype=np.float32)
C_TABLE[:4, :4] = np.array(
    [[17, 18, 24, 47],
     [18, 21, 26, 66],
     [24, 26, 56, 99],
     [47, 66, 99, 99]], dtype=np.float32).T

_BLOCK_ELEMS = 64  # one 8x8 DCT block, flattened row-major


def _c_quantize_kernel(img_ref, qtab_ref, out_ref, *, rounding_fn):
    # Elementwise: divide by the (pre-scaled) quant-table row and round.
    img = img_ref[...].astype(jnp.float32)            # (rows_tile, C)
    out_ref[...] = rounding_fn(img / qtab_ref[...])   # (1, C) broadcasts over rows


def c_quantize(image, factor=1.0, rounding=None):
    """image: (B, N, 8, 8). Returns rounding(image / (c_table * factor)) as f32."""
    if rounding is None:
        rounding = jnp.round
    B, N, H, W = image.shape
    assert (H, W) == (8, 8)
    total = B * N * _BLOCK_ELEMS

    # --- Lane-dense 2D view (R, C): C is a multiple of 128 (and of 64, so the
    # 8x8 table tiles evenly along the lane axis). Reshape is contiguous/free.
    C = None
    for cand in (2048, 1024, 512, 256, 128):
        if total % cand == 0:
            C = cand
            break
    flat = image.reshape(-1)
    pad = 0
    if C is None:                       # odd B*N: pad the tail (< 128 elems)
        C = 128
        pad = (-total) % C
        flat = jnp.pad(flat, (0, pad))
    R = (total + pad) // C
    x2d = flat.reshape(R, C)

    # --- Row tiling: target ~2 MiB per buffer so 2x double-buffered in+out
    # stays well under every generation's default scoped-VMEM limit.
    target_rows = max(8, (2 * 1024 * 1024) // (C * 4))
    if R <= target_rows:
        rows_per_tile = R               # full extent: always a legal block
    else:
        rows_per_tile = max(8, (target_rows // 8) * 8)
    grid = pl.cdiv(R, rows_per_tile)

    # Quant table tiled along the lane axis and pre-scaled by `factor`.
    # `factor` may be a Python float or a traced scalar (no kernel recompiles).
    qtab_row = jnp.asarray(np.tile(C_TABLE.reshape(-1), C // _BLOCK_ELEMS))
    qtab_row = (qtab_row * jnp.asarray(factor, jnp.float32)).reshape(1, C)

    kernel = functools.partial(_c_quantize_kernel, rounding_fn=rounding)
    out2d = pl.pallas_call(
        kernel,
        out_shape=jax.ShapeDtypeStruct((R, C), jnp.float32),
        grid_spec=pltpu.PrefetchScalarGridSpec(
            num_scalar_prefetch=0,
            grid=(grid,),
            in_specs=[
                pl.BlockSpec((rows_per_tile, C), lambda i: (i, 0)),
                pl.BlockSpec((1, C), lambda i: (0, 0)),  # same block every step -> DMA'd once
            ],
            out_specs=pl.BlockSpec((rows_per_tile, C), lambda i: (i, 0)),
        ),
        compiler_params=pltpu.CompilerParams(
            dimension_semantics=("parallel",)),
    )(x2d, qtab_row)

    out = out2d.reshape(-1)
    if pad:
        out = out[:total]
    return out.reshape(B, N, 8, 8)


if __name__ == "__main__":
    key = jax.random.PRNGKey(0)
    k1, k2 = jax.random.split(key)

    # Main check: batch=2, 16 DCT blocks of 8x8 (lane-dense path, C=2048).
    B, N = 2, 16
    image = jax.random.uniform(k1, (B, N, 8, 8), jnp.float32,
                               minval=-400.0, maxval=400.0)
    factor = 2.0
    out = jax.block_until_ready(c_quantize(image, factor=factor))
    ref = jnp.round(image / (jnp.asarray(C_TABLE) * jnp.float32(factor)))
    assert out.shape == (B, N, 8, 8)
    assert out.dtype == jnp.float32
    np.testing.assert_allclose(np.asarray(out), np.asarray(ref), atol=1e-6)

    # Secondary check: odd B*N exercises the padded fallback path.
    image2 = jax.random.uniform(k2, (1, 3, 8, 8), jnp.float32,
                                minval=-400.0, maxval=400.0)
    out2 = jax.block_until_ready(c_quantize(image2, factor=1.0))
    ref2 = jnp.round(image2 / jnp.asarray(C_TABLE))
    np.testing.assert_allclose(np.asarray(out2), np.asarray(ref2), atol=1e-6)

    # Custom differentiable rounding (DiffJPEG diff_round), traced into kernel.
    diff_round = lambda x: jnp.round(x) + (x - jnp.round(x)) ** 3
    out3 = jax.block_until_ready(c_quantize(image, factor=factor,
                                            rounding=diff_round))
    ref3 = diff_round(image / (jnp.asarray(C_TABLE) * jnp.float32(factor)))
    np.testing.assert_allclose(np.asarray(out3), np.asarray(ref3),
                               atol=1e-5, rtol=1e-5)

    print("KERNEL_OK")
</pallas_src>

<mosaic_0001>
module attributes {stable_mosaic.version = 11 : i64} {
  func.func @_c_quantize_kernel(%arg0: i32, %arg1: memref<1x2048xf32, #tpu.memory_space<vmem>>, %arg2: memref<1x2048xf32, #tpu.memory_space<vmem>>, %arg3: memref<1x2048xf32, #tpu.memory_space<vmem>>) attributes {dimension_semantics = [#tpu.dimension_semantics<parallel>], iteration_bounds = array<i64: 1>, scalar_prefetch = 0 : i64, scratch_operands = 0 : i64, tpu.core_type = #tpu.core_type<tc>, window_params = [{transform_indices = @transform_0, window_bounds = array<i64: 1, 2048>}, {pipeline_mode = #tpu.pipeline_mode<synchronous>, transform_indices = @transform_1, window_bounds = array<i64: 1, 2048>}, {transform_indices = @transform_2, window_bounds = array<i64: 1, 2048>}]} {
    %c0 = arith.constant 0 : index
    %c0_0 = arith.constant 0 : index
    %0 = vector.load %arg1[%c0, %c0_0] : memref<1x2048xf32, #tpu.memory_space<vmem>>, vector<1x2048xf32>
    %c0_1 = arith.constant 0 : index
    %c0_2 = arith.constant 0 : index
    %1 = vector.load %arg2[%c0_1, %c0_2] : memref<1x2048xf32, #tpu.memory_space<vmem>>, vector<1x2048xf32>
    %2 = arith.divf %0, %1 : vector<1x2048xf32>
    %3 = math.roundeven %2 : vector<1x2048xf32>
    %c0_3 = arith.constant 0 : index
    %c0_4 = arith.constant 0 : index
    %4 = vector.load %arg3[%c0_3, %c0_4] : memref<1x2048xf32, #tpu.memory_space<vmem>>, vector<1x2048xf32>
    tpu.vector_store %arg3[%c0_3, %c0_4], %3 {strides = array<i32>} : memref<1x2048xf32, #tpu.memory_space<vmem>>, vector<1x2048xf32>,
    return
  }
  func.func @transform_0(%arg0: i32) -> (i32, i32) {
    %c0_i32 = arith.constant 0 : i32
    %c0_i32_0 = arith.constant 0 : i32
    return %arg0, %c0_i32 : i32, i32
  }
  func.func @transform_1(%arg0: i32) -> (i32, i32) {
    %c0_i32 = arith.constant 0 : i32
    %c0_i32_0 = arith.constant 0 : i32
    %c0_i32_1 = arith.constant 0 : i32
    return %c0_i32, %c0_i32_0 : i32, i32
  }
  func.func @transform_2(%arg0: i32) -> (i32, i32) {
    %c0_i32 = arith.constant 0 : i32
    %c0_i32_0 = arith.constant 0 : i32
    return %arg0, %c0_i32 : i32, i32
  }
}

</mosaic_0001>

<bundles_post_ra>
// kernel: tpu_custom_call.1
= control target key start
LH: loop header
LB: loop body
LE: loop exit
PB: predicated region body
PF: predicated region fallthrough
CT: control target
= control target key end

     0   :  { %7 = vsyncpa [#allocation3], 0  ;;  %s180_s0 = inlined_call_operand.hbm [shape: f32[1,2048], index: 0, kind: input, shape index: {}]   ;;  %s181_s1 = inlined_call_operand.hbm [shape: f32[1,2048], index: 1, kind: input, shape index: {}]   ;;  %s182_s2 = inlined_call_operand.hbm [shape: f32[1,2048], index: 2, kind: output, shape index: {}]  }
   0x1   :  { %8 = vsyncpa [#allocation6], 0 }
   0x2   :  { %9 = vsyncpa [#allocation4], 0  ;;  %s153_s9 = smov [#allocation2]   ;;  %s154_s11 = smov [#allocation5]  }
   0x3   :  { %s16_s10 = sshll.u32 %s153_s9, 4  ;;  %s26_s12 = sshll.u32 %s154_s11, 4  ;;  %s17_s10 = int_to_ptr.vmem [resolvable:$true] %s16_s10  ;;  %s27_s12 = int_to_ptr.vmem [resolvable:$true] %s26_s12 }
   0x4   :  { %s95_s13 = scalar_lea.vmem %s17_s10, 256  ;;  %p100_p1 = scmp.lt.s32.totalorder %s17_s10, %s17_s10 }
   0x5   :  { %p96_p0 = scmp.ne.s32.totalorder %s17_s10, %s95_s13  ;;  %p101_p2 = scmp.lt.s32.totalorder %s95_s13, %s95_s13 }
   0x7   :  { %p102_p3 = por %p101_p2, %p100_p1 }
   0x9   :  { %p103_p4 = pnand %p102_p3, %p96_p0 }
   0xb   :  { %106 = shalt.err (!%p103_p4)
}
   0xc   :  { %19 = dma.hbm_to_vmem [thread:$0]  %s180_s0, 256, %s17_s10, [#allocation3]  }
   0xd   :  { %s115_s16 = scalar_lea.vmem %s27_s12, 256  ;;  %p120_p6 = scmp.lt.s32.totalorder %s27_s12, %s27_s12 }
   0xe   :  { %p116_p5 = scmp.ne.s32.totalorder %s27_s12, %s115_s16  ;;  %p121_p7 = scmp.lt.s32.totalorder %s115_s16, %s115_s16 }
  0x10   :  { %p122_p8 = por %p121_p7, %p120_p6 }
  0x12   :  { %p123_p9 = pnand %p122_p8, %p116_p5 }
  0x14   :  { %126 = shalt.err (!%p123_p9)
}
  0x15   :  { %29 = dma.hbm_to_vmem [thread:$0]  %s181_s1, 256, %s27_s12, [#allocation6]  }
  0x16   :  { %147 = dma.done.wait [#allocation3], 256  }
  0x17   :  { %148 = vsyncadd [#allocation3], 4294967040 }
  0x18   :  { %149 = dma.done.wait [#allocation6], 256  }
  0x19   :  { %150 = vsyncadd [#allocation6], 4294967040  ;;  %v38_v0 = vld [vmem:[#allocation5] sm:$0xff]  ;;  %v39_v1 = vld [vmem:[#allocation5 + $0x8] sm:$0xff]  ;;  %s155_s0 = smov [#allocation7]  }
  0x1a   :  { %83 = vrcp.f32 %v38_v0  ;;  %v36_v2 = vld [vmem:[#allocation2] sm:$0xff]  ;;  %v37_v3 = vld [vmem:[#allocation2 + $0x8] sm:$0xff]  ;;  %s54_s1 = sshll.u32 %s155_s0, 4  ;;  %s55_s1 = int_to_ptr.vmem [resolvable:$true] %s54_s1 }
  0x1b   :  { %85 = vrcp.f32 %v39_v1  ;;  %s127_s19 = scalar_lea.vmem %s55_s1, 256  ;;  %p132_p11 = scmp.lt.s32.totalorder %s55_s1, %s55_s1 }
  0x1c   :  { %p128_p10 = scmp.ne.s32.totalorder %s55_s1, %s127_s19  ;;  %p133_p12 = scmp.lt.s32.totalorder %s127_s19, %s127_s19 }
  0x1e   :  { %p134_p13 = por %p133_p12, %p132_p11 }
  0x20   :  { %p135_p0 = pnand %p134_p13, %p128_p10 }
  0x27   :  { %v84_v4 = vpop.eup %83 }
  0x28   :  { %v86_v5 = vpop.eup %85  ;;  %v41_v6 = vmul.f32 %v84_v4, %v36_v2 }
  0x29   :  { %v43_v7 = vmul.f32 %v86_v5, %v37_v3 }
  0x2a   :  { %v66_v8 = vcvt.f32.s32 %v41_v6  ;;  %v64_v9 = vand.u32 2147483647, %v41_v6  ;;  %v69_v12 = vand.u32 2147483648, %v41_v6 }
  0x2b   :  { %v74_v10 = vcvt.f32.s32 %v43_v7  ;;  %v72_v13 = vand.u32 2147483647, %v43_v7  ;;  %v77_v15 = vand.u32 2147483648, %v43_v7 }
  0x2c   :  { %v67_v11 = vcvt.s32.f32 %v66_v8  ;;  %vm65_vm0 = vcmp.lt.f32.partialorder %v64_v9, 8388608.0 }
  0x2d   :  { %v75_v14 = vcvt.s32.f32 %v74_v10  ;;  %vm73_vm1 = vcmp.lt.f32.partialorder %v72_v13, 8388608.0 }
  0x2e   :  { %v68_v16 = vand.u32 2147483647, %v67_v11 }
  0x2f   :  { %v76_v17 = vand.u32 2147483647, %v75_v14 }
  0x30   :  { %v70_v18 = vor.u32 %v69_v12, %v68_v16 }
  0x31   :  { %v78_v19 = vor.u32 %v77_v15, %v76_v17 }
  0x32   :  { %v71_v20 = vsel %vm65_vm0, %v70_v18, %v41_v6 }
  0x33   :  { %46 = vst [vmem:[#allocation7] sm:$0xff] %v71_v20  ;;  %v79_v21 = vsel %vm73_vm1, %v78_v19, %v43_v7 }
  0x34   :  { %47 = vst [vmem:[#allocation7 + $0x8] sm:$0xff] %v79_v21 }
  0x35   :  { %138 = shalt.err (!%p135_p0)
}
  0x36   :  { %57 = dma.vmem_to_hbm [thread:$0]  %s55_s1, 256, %s182_s2, [#allocation4]  }
  0x37   :  { %151 = dma.done.wait [#allocation4], 256  }
  0x38   :  { %152 = vsyncadd [#allocation4], 4294967040 }
  0x39   :  { %61 = vsyncpa [#allocation3], 1 }
  0x3a   :  { %62 = vsyncpa [#allocation6], 1 }
  0x3b   :  { %63 = vsyncpa [#allocation4], 1 }

</bundles_post_ra>
